<compile_context>
chip_gen: v6e
topology: v6e:2x2x1
jax: 0.10.0
libtpu: 0.0.40
codegen_flags: <defaults>
</compile_context>

<pallas_src>
import functools

import jax
import jax.numpy as jnp
from jax.experimental import pallas as pl
from jax.experimental.pallas import tpu as pltpu


def _cdiv(a, b):
    return (a + b - 1) // b


def _round_up(a, b):
    return _cdiv(a, b) * b


def _default_bf16_act():
    """bf16 transcendentals only on generations with a bf16 EUP/VPU (v6e, v7x)."""
    try:
        kind = jax.devices()[0].device_kind.lower()
    except Exception:
        return False
    return ("v6" in kind) or ("v7" in kind)


# -----------------------------------------------------------------------------
# Kernel
# -----------------------------------------------------------------------------
def gru_unit_kernel(
    a_ref,       # (TILE_N, W) f32 : fused [y_mean | y_std | x | zeros]
    w1_ur_ref,   # (W, 2Hp) bf16   : fused update|reset first layer
    b1_ur_ref,   # (1, 2Hp) f32
    w2_g_ref,    # (2Hp, W) bf16   : gate slab layout [r, r | pad | u, u]
    b2_g_ref,    # (1, W)   f32
    w1_n_ref,    # (W, Hp)  bf16   : new-state first layer
    b1_n_ref,    # (1, Hp)  f32
    w2_n_ref,    # (Hp, W)  bf16   : [new_state | new_state_std | zeros]
    b2_n_ref,    # (1, W)   f32
    out_ref,     # (TILE_N, W) f32 : [new_y | new_y_std | don't-care]
    *,
    latent_dim,
    n_data_dims,
    bf16_act,
):
    L = latent_dim
    act_dtype = jnp.bfloat16 if bf16_act else jnp.float32

    af = a_ref[...]                                  # f32, carry path stays f32
    af_b = af.astype(jnp.bfloat16)

    # --- fused update/reset first layer: one matmul over the 128-lane input
    pre_ur = (jnp.dot(af_b, w1_ur_ref[...], preferred_element_type=jnp.float32)
              + b1_ur_ref[...])
    h_ur = jnp.tanh(pre_ur.astype(act_dtype))        # bf16 on v6e/v7x (bf16 EUP)
    h_ur_b = h_ur if bf16_act else h_ur.astype(jnp.bfloat16)

    # --- gate slab, lane layout [r, r | pad | u, u]
    pre_g = (jnp.dot(h_ur_b, w2_g_ref[...], preferred_element_type=jnp.float32)
             + b2_g_ref[...])
    g = jax.nn.sigmoid(pre_g.astype(act_dtype)).astype(jnp.float32)

    lane = jax.lax.broadcasted_iota(jnp.int32, af.shape, 1)

    # --- reset-gate the fused input: [ym*r, ys*r, x, 0] via a single select-multiply
    factor = jnp.where(lane < 2 * L, g, 1.0)
    ag_b = (af * factor).astype(jnp.bfloat16)

    # --- new-state net (one fused first-layer matmul + output layer)
    pre_n = (jnp.dot(ag_b, w1_n_ref[...], preferred_element_type=jnp.float32)
             + b1_n_ref[...])
    h_n = jnp.tanh(pre_n.astype(act_dtype))
    h_n_b = h_n if bf16_act else h_n.astype(jnp.bfloat16)
    ns = (jnp.dot(h_n_b, w2_n_ref[...], preferred_element_type=jnp.float32)
          + b2_n_ref[...])                           # [new_state | new_state_std | 0]

    is_std = (lane >= L) & (lane < 2 * L)
    ns = jnp.where(is_std, jnp.abs(ns), ns)          # abs() only on new_state_std

    # --- update gate to lanes [0, 2L): u was packed at the tail, one XLU roll
    u_c = pltpu.roll(g, shift=2 * L, axis=1)

    # --- masked GRU blend, mask folded into the gate weight
    # TODO(synk): utils.check_mask / isnan asserts are host-side checks, not reproduced.
    msum = jnp.sum(jnp.where(lane >= 2 * L + n_data_dims, af, 0.0),
                   axis=-1, keepdims=True)           # sum over the mask half of x
    m = (msum > 0.0).astype(jnp.float32)             # (TILE_N, 1)
    w = m * (1.0 - u_c)
    out = w * ns + (1.0 - w) * af                    # lanes >= 2L are don't-care

    # final .abs() on the std half (matches the reference's trailing new_y_std.abs())
    out_ref[...] = jnp.where(is_std, jnp.abs(out), out)


# -----------------------------------------------------------------------------
# Parameter init (mirrors utils.init_network_weights: W ~ N(0, 0.1), b = 0)
# -----------------------------------------------------------------------------
def init_gru_unit_params(key, latent_dim, input_dim, n_units):
    d_concat = 2 * latent_dim + input_dim
    ks = jax.random.split(key, 6)
    std = 0.1

    def w(k, shape):
        return jax.random.normal(k, shape, dtype=jnp.float32) * std

    return dict(
        wu1=w(ks[0], (d_concat, n_units)), bu1=jnp.zeros((1, n_units), jnp.float32),
        wu2=w(ks[1], (n_units, latent_dim)), bu2=jnp.zeros((1, latent_dim), jnp.float32),
        wr1=w(ks[2], (d_concat, n_units)), br1=jnp.zeros((1, n_units), jnp.float32),
        wr2=w(ks[3], (n_units, latent_dim)), br2=jnp.zeros((1, latent_dim), jnp.float32),
        wn1=w(ks[4], (d_concat, n_units)), bn1=jnp.zeros((1, n_units), jnp.float32),
        wn2=w(ks[5], (n_units, 2 * latent_dim)),
        bn2=jnp.zeros((1, 2 * latent_dim), jnp.float32),
    )


# -----------------------------------------------------------------------------
# Weight re-packing for the kernel (done once, outside the kernel)
# -----------------------------------------------------------------------------
def prepare_gru_weights(params, latent_dim, input_dim):
    """Pad everything to a common 128-lane width W, fuse update+reset, cast to bf16.

    Layouts:
      w1_ur: (W, 2Hp) = [Wu1 | Wr1]  (rows = fused input [yc | x | pad])
      w2_g : (2Hp, W) producing gate slab [r, r | pad | u, u]
      w1_n : (W, Hp)
      w2_n : (Hp, W) producing [new_state | new_state_std | zeros]
    """
    L, Dx = latent_dim, input_dim
    d_cat = 2 * L + Dx
    n_units = params["wu1"].shape[1]
    wpad = max(_round_up(max(d_cat, 4 * L), 128), 128)   # common lane width
    hp = max(_round_up(n_units, 128), 128)               # padded hidden width

    def pad_to(a, rows, cols):
        return jnp.pad(a, ((0, rows - a.shape[0]), (0, cols - a.shape[1])))

    # fused update|reset first layer
    w1_ur = jnp.concatenate(
        [pad_to(params["wu1"], wpad, hp), pad_to(params["wr1"], wpad, hp)], axis=1)
    b1_ur = jnp.concatenate(
        [pad_to(params["bu1"], 1, hp), pad_to(params["br1"], 1, hp)], axis=1)

    # new-state first layer
    w1_n = pad_to(params["wn1"], wpad, hp)
    b1_n = pad_to(params["bn1"], 1, hp)

    # second gate layer -> [r, r | pad | u, u] over wpad lanes
    wu2p = pad_to(params["wu2"], hp, L)
    wr2p = pad_to(params["wr2"], hp, L)
    zc = jnp.zeros((hp, L), jnp.float32)
    mid = wpad - 4 * L
    zmid = jnp.zeros((hp, mid), jnp.float32)
    w2_g = jnp.concatenate(
        [jnp.concatenate([zc, zc, zmid, wu2p, wu2p], axis=1),     # rows fed by h_u
         jnp.concatenate([wr2p, wr2p, zmid, zc, zc], axis=1)],    # rows fed by h_r
        axis=0)                                                   # (2Hp, W)
    b2_g = jnp.concatenate(
        [params["br2"], params["br2"], jnp.zeros((1, mid), jnp.float32),
         params["bu2"], params["bu2"]], axis=1)                   # (1, W)

    # new-state output layer, padded to W lanes for lane-dense stores downstream
    w2_n = pad_to(params["wn2"], hp, wpad)
    b2_n = pad_to(params["bn2"], 1, wpad)

    bf = lambda a: a.astype(jnp.bfloat16)
    return dict(
        w1_ur=bf(w1_ur), b1_ur=b1_ur, w2_g=bf(w2_g), b2_g=b2_g,
        w1_n=bf(w1_n), b1_n=b1_n, w2_n=bf(w2_n), b2_n=b2_n,
        wpad=wpad, hp=hp,
    )


# -----------------------------------------------------------------------------
# Forward wrapper
# -----------------------------------------------------------------------------
def gru_unit_forward(params, y_mean, y_std, x, latent_dim, *,
                     tile_n=1024, min_grid_steps=8, bf16_act=None):
    """tile_n=1024 keeps per-buffer tiles at ~0.5 MiB (safe on v7x's 64 MiB VMEM while
    still amortizing per-step grid overhead); v5e/v6e can raise it to 2048+."""
    T, B, L = y_mean.shape
    Dx = x.shape[-1]
    N = T * B
    if bf16_act is None:
        bf16_act = _default_bf16_act()

    w = prepare_gru_weights(params, L, Dx)
    wpad = w["wpad"]

    # Fused 128-lane activation [y_mean | y_std | x | zeros].
    # TODO(synk): when this GRU runs inside a latent-ODE recurrence, keep the state in
    # this packed (N, W) layout across steps so the concat/pad/split below are one-time.
    af = jnp.concatenate(
        [y_mean.reshape(N, L).astype(jnp.float32),
         y_std.reshape(N, L).astype(jnp.float32),
         x.reshape(N, Dx).astype(jnp.float32)], axis=-1)
    af = jnp.pad(af, ((0, 0), (0, wpad - (2 * L + Dx))))

    # Adaptive row-tile: bounded tail-padding waste, >= min_grid_steps steps when N
    # allows (feeds both v7x TensorCores), tile a multiple of 8 sublanes.
    n_steps = max(_cdiv(N, tile_n), min(min_grid_steps, _cdiv(N, 8)), 1)
    tn = _round_up(_cdiv(N, n_steps), 8)
    n_pad = _round_up(N, tn)
    if n_pad != N:
        af = jnp.pad(af, ((0, n_pad - N), (0, 0)))

    weight_args = (w["w1_ur"], w["b1_ur"], w["w2_g"], w["b2_g"],
                   w["w1_n"], w["b1_n"], w["w2_n"], w["b2_n"])

    row_spec = pl.BlockSpec((tn, wpad), lambda i: (i, 0))
    resident = lambda arr: pl.BlockSpec(arr.shape, lambda i: (0, 0))

    kernel = functools.partial(gru_unit_kernel, latent_dim=L,
                               n_data_dims=Dx // 2, bf16_act=bf16_act)

    out = pl.pallas_call(
        kernel,
        out_shape=jax.ShapeDtypeStruct((n_pad, wpad), jnp.float32),
        grid_spec=pltpu.PrefetchScalarGridSpec(
            num_scalar_prefetch=0,
            grid=(n_pad // tn,),
            in_specs=[row_spec] + [resident(a) for a in weight_args],
            out_specs=pl.BlockSpec((tn, wpad), lambda i: (i, 0)),
        ),
        # Working set is a few MiB; default scoped VMEM limit is plenty on all
        # generations, so don't request v7x's entire 64 MiB.
        compiler_params=pltpu.CompilerParams(
            dimension_semantics=("parallel",),
        ),
    )(af, *weight_args)

    new_y = out[:N, :L].reshape(T, B, L)
    new_y_std = out[:N, L:2 * L].reshape(T, B, L)
    return new_y, new_y_std


# -----------------------------------------------------------------------------
# Pure-JAX reference (mirrors the PyTorch forward) for correctness checking
# -----------------------------------------------------------------------------
def gru_unit_reference(params, y_mean, y_std, x):
    y_concat = jnp.concatenate([y_mean, y_std, x], -1)
    u = jax.nn.sigmoid(
        jnp.tanh(y_concat @ params["wu1"] + params["bu1"]) @ params["wu2"] + params["bu2"])
    r = jax.nn.sigmoid(
        jnp.tanh(y_concat @ params["wr1"] + params["br1"]) @ params["wr2"] + params["br2"])
    concat = jnp.concatenate([y_mean * r, y_std * r, x], -1)
    ns_full = jnp.tanh(concat @ params["wn1"] + params["bn1"]) @ params["wn2"] + params["bn2"]
    L = y_mean.shape[-1]
    new_state = ns_full[..., :L]
    new_state_std = jnp.abs(ns_full[..., L:])
    new_y = (1 - u) * new_state + u * y_mean
    new_y_std = (1 - u) * new_state_std + u * y_std
    n_data = x.shape[-1] // 2
    mask = (jnp.sum(x[..., n_data:], -1, keepdims=True) > 0).astype(jnp.float32)
    new_y = mask * new_y + (1 - mask) * y_mean
    new_y_std = mask * new_y_std + (1 - mask) * y_std
    return new_y, jnp.abs(new_y_std)


if __name__ == "__main__":
    latent_dim = 32
    input_dim = 16          # = 2 * n_data_dims (data half + mask half)
    n_units = 100
    T, B = 2, 8             # (n_traj_samples, batch)

    key = jax.random.PRNGKey(0)
    kp, kym, kys, kxd, kmask = jax.random.split(key, 5)

    params = init_gru_unit_params(kp, latent_dim, input_dim, n_units)

    y_mean = jax.random.normal(kym, (T, B, latent_dim), dtype=jnp.float32)
    y_std = jnp.abs(jax.random.normal(kys, (T, B, latent_dim), dtype=jnp.float32))

    # build x = [data, mask] such that data is zero wherever mask is zero
    n_data_dims = input_dim // 2
    mask = (jax.random.uniform(kmask, (T, B, n_data_dims)) > 0.4).astype(jnp.float32)
    data = jax.random.normal(kxd, (T, B, n_data_dims), dtype=jnp.float32) * mask
    x = jnp.concatenate([data, mask], axis=-1)

    new_y, new_y_std = gru_unit_forward(params, y_mean, y_std, x, latent_dim)
    jax.block_until_ready((new_y, new_y_std))

    ref_y, ref_y_std = gru_unit_reference(params, y_mean, y_std, x)

    assert new_y.shape == (T, B, latent_dim)
    assert new_y_std.shape == (T, B, latent_dim)
    assert bool(jnp.all(jnp.isfinite(new_y)))
    assert bool(jnp.all(new_y_std >= 0))
    # bf16 weights/activations -> generous tolerance, still catches wiring bugs (O(1) errors)
    assert float(jnp.max(jnp.abs(new_y - ref_y))) < 0.1
    assert float(jnp.max(jnp.abs(new_y_std - ref_y_std))) < 0.1

    print("KERNEL_OK")
</pallas_src>

<mosaic_0001>
module attributes {stable_mosaic.version = 11 : i64} {
  func.func @gru_unit_kernel(%arg0: i32, %arg1: memref<8x128xf32, #tpu.memory_space<vmem>>, %arg2: memref<128x256xbf16, #tpu.memory_space<vmem>>, %arg3: memref<1x256xf32, #tpu.memory_space<vmem>>, %arg4: memref<256x128xbf16, #tpu.memory_space<vmem>>, %arg5: memref<1x128xf32, #tpu.memory_space<vmem>>, %arg6: memref<128x128xbf16, #tpu.memory_space<vmem>>, %arg7: memref<1x128xf32, #tpu.memory_space<vmem>>, %arg8: memref<128x128xbf16, #tpu.memory_space<vmem>>, %arg9: memref<1x128xf32, #tpu.memory_space<vmem>>, %arg10: memref<8x128xf32, #tpu.memory_space<vmem>>) attributes {dimension_semantics = [#tpu.dimension_semantics<parallel>], iteration_bounds = array<i64: 2>, scalar_prefetch = 0 : i64, scratch_operands = 0 : i64, tpu.core_type = #tpu.core_type<tc>, window_params = [{transform_indices = @transform_0, window_bounds = array<i64: 8, 128>}, {pipeline_mode = #tpu.pipeline_mode<synchronous>, transform_indices = @transform_1, window_bounds = array<i64: 128, 256>}, {pipeline_mode = #tpu.pipeline_mode<synchronous>, transform_indices = @transform_2, window_bounds = array<i64: 1, 256>}, {pipeline_mode = #tpu.pipeline_mode<synchronous>, transform_indices = @transform_3, window_bounds = array<i64: 256, 128>}, {pipeline_mode = #tpu.pipeline_mode<synchronous>, transform_indices = @transform_4, window_bounds = array<i64: 1, 128>}, {pipeline_mode = #tpu.pipeline_mode<synchronous>, transform_indices = @transform_5, window_bounds = array<i64: 128, 128>}, {pipeline_mode = #tpu.pipeline_mode<synchronous>, transform_indices = @transform_6, window_bounds = array<i64: 1, 128>}, {pipeline_mode = #tpu.pipeline_mode<synchronous>, transform_indices = @transform_7, window_bounds = array<i64: 128, 128>}, {pipeline_mode = #tpu.pipeline_mode<synchronous>, transform_indices = @transform_8, window_bounds = array<i64: 1, 128>}, {transform_indices = @transform_9, window_bounds = array<i64: 8, 128>}]} {
    %c0 = arith.constant 0 : index
    %c0_0 = arith.constant 0 : index
    %0 = vector.load %arg1[%c0, %c0_0] : memref<8x128xf32, #tpu.memory_space<vmem>>, vector<8x128xf32>
    %1 = arith.truncf %0 : vector<8x128xf32> to vector<8x128xbf16>
    %c0_1 = arith.constant 0 : index
    %c0_2 = arith.constant 0 : index
    %2 = vector.load %arg2[%c0_1, %c0_2] : memref<128x256xbf16, #tpu.memory_space<vmem>>, vector<128x256xbf16>
    %cst = arith.constant dense<0.000000e+00> : vector<8x256xf32>
    %3 = tpu.matmul %1, %2, %cst {dimension_numbers = #tpu.dot_dimension_numbers<[1], [0], [0], [1], [0, 0, 1, 1], [], []>} : vector<8x128xbf16>, vector<128x256xbf16>, vector<8x256xf32> -> vector<8x256xf32>
    %c0_3 = arith.constant 0 : index
    %c0_4 = arith.constant 0 : index
    %4 = vector.load %arg3[%c0_3, %c0_4] : memref<1x256xf32, #tpu.memory_space<vmem>>, vector<1x256xf32>
    %5 = vector.broadcast %4 : vector<1x256xf32> to vector<8x256xf32>
    %6 = arith.addf %3, %5 : vector<8x256xf32>
    %7 = math.tanh %6 : vector<8x256xf32>
    %8 = arith.truncf %7 : vector<8x256xf32> to vector<8x256xbf16>
    %c0_5 = arith.constant 0 : index
    %c0_6 = arith.constant 0 : index
    %9 = vector.load %arg4[%c0_5, %c0_6] : memref<256x128xbf16, #tpu.memory_space<vmem>>, vector<256x128xbf16>
    %cst_7 = arith.constant dense<0.000000e+00> : vector<8x128xf32>
    %10 = tpu.matmul %8, %9, %cst_7 {dimension_numbers = #tpu.dot_dimension_numbers<[1], [0], [0], [1], [0, 0, 1, 1], [], []>} : vector<8x256xbf16>, vector<256x128xbf16>, vector<8x128xf32> -> vector<8x128xf32>
    %c0_8 = arith.constant 0 : index
    %c0_9 = arith.constant 0 : index
    %11 = vector.load %arg5[%c0_8, %c0_9] : memref<1x128xf32, #tpu.memory_space<vmem>>, vector<1x128xf32>
    %12 = vector.broadcast %11 : vector<1x128xf32> to vector<8x128xf32>
    %13 = arith.addf %10, %12 : vector<8x128xf32>
    %14 = arith.negf %13 : vector<8x128xf32>
    %15 = math.exp %14 : vector<8x128xf32>
    %cst_10 = arith.constant 1.000000e+00 : f32
    %16 = vector.broadcast %cst_10 : f32 to vector<8x128xf32>
    %17 = arith.addf %16, %15 : vector<8x128xf32>
    %18 = arith.divf %16, %17 : vector<8x128xf32>
    %19 = tpu.iota {dimensions = array<i32: 1>} : vector<8x128xi32>
    %c64_i32 = arith.constant 64 : i32
    %20 = vector.broadcast %c64_i32 : i32 to vector<8x128xi32>
    %21 = arith.cmpi slt, %19, %20 : vector<8x128xi32>
    %cst_11 = arith.constant 1.000000e+00 : f32
    %22 = vector.broadcast %cst_11 : f32 to vector<8x128xf32>
    %23 = arith.select %21, %18, %22 : vector<8x128xi1>, vector<8x128xf32>
    %24 = arith.mulf %0, %23 : vector<8x128xf32>
    %25 = arith.truncf %24 : vector<8x128xf32> to vector<8x128xbf16>
    %c0_12 = arith.constant 0 : index
    %c0_13 = arith.constant 0 : index
    %26 = vector.load %arg6[%c0_12, %c0_13] : memref<128x128xbf16, #tpu.memory_space<vmem>>, vector<128x128xbf16>
    %cst_14 = arith.constant dense<0.000000e+00> : vector<8x128xf32>
    %27 = tpu.matmul %25, %26, %cst_14 {dimension_numbers = #tpu.dot_dimension_numbers<[1], [0], [0], [1], [0, 0, 1, 1], [], []>} : vector<8x128xbf16>, vector<128x128xbf16>, vector<8x128xf32> -> vector<8x128xf32>
    %c0_15 = arith.constant 0 : index
    %c0_16 = arith.constant 0 : index
    %28 = vector.load %arg7[%c0_15, %c0_16] : memref<1x128xf32, #tpu.memory_space<vmem>>, vector<1x128xf32>
    %29 = vector.broadcast %28 : vector<1x128xf32> to vector<8x128xf32>
    %30 = arith.addf %27, %29 : vector<8x128xf32>
    %31 = math.tanh %30 : vector<8x128xf32>
    %32 = arith.truncf %31 : vector<8x128xf32> to vector<8x128xbf16>
    %c0_17 = arith.constant 0 : index
    %c0_18 = arith.constant 0 : index
    %33 = vector.load %arg8[%c0_17, %c0_18] : memref<128x128xbf16, #tpu.memory_space<vmem>>, vector<128x128xbf16>
    %cst_19 = arith.constant dense<0.000000e+00> : vector<8x128xf32>
    %34 = tpu.matmul %32, %33, %cst_19 {dimension_numbers = #tpu.dot_dimension_numbers<[1], [0], [0], [1], [0, 0, 1, 1], [], []>} : vector<8x128xbf16>, vector<128x128xbf16>, vector<8x128xf32> -> vector<8x128xf32>
    %c0_20 = arith.constant 0 : index
    %c0_21 = arith.constant 0 : index
    %35 = vector.load %arg9[%c0_20, %c0_21] : memref<1x128xf32, #tpu.memory_space<vmem>>, vector<1x128xf32>
    %36 = vector.broadcast %35 : vector<1x128xf32> to vector<8x128xf32>
    %37 = arith.addf %34, %36 : vector<8x128xf32>
    %c32_i32 = arith.constant 32 : i32
    %38 = vector.broadcast %c32_i32 : i32 to vector<8x128xi32>
    %39 = arith.cmpi sge, %19, %38 : vector<8x128xi32>
    %c64_i32_22 = arith.constant 64 : i32
    %40 = vector.broadcast %c64_i32_22 : i32 to vector<8x128xi32>
    %41 = arith.cmpi slt, %19, %40 : vector<8x128xi32>
    %42 = arith.andi %39, %41 : vector<8x128xi1>
    %43 = math.absf %37 : vector<8x128xf32>
    %44 = arith.select %42, %43, %37 : vector<8x128xi1>, vector<8x128xf32>
    %c64_i32_23 = arith.constant 64 : i32
    %45 = tpu.dynamic_rotate %18 by %c64_i32_23 dim 1 : vector<8x128xf32>, i32 -> vector<8x128xf32>
    %c72_i32 = arith.constant 72 : i32
    %46 = vector.broadcast %c72_i32 : i32 to vector<8x128xi32>
    %47 = arith.cmpi sge, %19, %46 : vector<8x128xi32>
    %cst_24 = arith.constant 0.000000e+00 : f32
    %48 = vector.broadcast %cst_24 : f32 to vector<8x128xf32>
    %49 = arith.select %47, %0, %48 : vector<8x128xi1>, vector<8x128xf32>
    %cst_25 = arith.constant dense<0.000000e+00> : vector<8xf32>
    %50 = vector.multi_reduction <add>, %49, %cst_25 [1] : vector<8x128xf32> to vector<8xf32>
    %51 = vector.shape_cast %50 : vector<8xf32> to vector<8x1xf32>
    %cst_26 = arith.constant 0.000000e+00 : f32
    %52 = vector.broadcast %cst_26 : f32 to vector<8x1xf32>
    %53 = arith.cmpf ogt, %51, %52 : vector<8x1xf32>
    %54 = arith.extui %53 : vector<8x1xi1> to vector<8x1xi32>
    %55 = arith.sitofp %54 : vector<8x1xi32> to vector<8x1xf32>
    %cst_27 = arith.constant 1.000000e+00 : f32
    %56 = vector.broadcast %cst_27 : f32 to vector<8x128xf32>
    %57 = arith.subf %56, %45 : vector<8x128xf32>
    %58 = vector.broadcast %55 : vector<8x1xf32> to vector<8x128xf32>
    %59 = arith.mulf %58, %57 : vector<8x128xf32>
    %60 = arith.mulf %59, %44 : vector<8x128xf32>
    %cst_28 = arith.constant 1.000000e+00 : f32
    %61 = vector.broadcast %cst_28 : f32 to vector<8x128xf32>
    %62 = arith.subf %61, %59 : vector<8x128xf32>
    %63 = arith.mulf %62, %0 : vector<8x128xf32>
    %64 = arith.addf %60, %63 : vector<8x128xf32>
    %65 = math.absf %64 : vector<8x128xf32>
    %66 = arith.select %42, %65, %64 : vector<8x128xi1>, vector<8x128xf32>
    %c0_29 = arith.constant 0 : index
    %c0_30 = arith.constant 0 : index
    %67 = vector.load %arg10[%c0_29, %c0_30] : memref<8x128xf32, #tpu.memory_space<vmem>>, vector<8x128xf32>
    tpu.vector_store %arg10[%c0_29, %c0_30], %66 {strides = array<i32>} : memref<8x128xf32, #tpu.memory_space<vmem>>, vector<8x128xf32>,
    return
  }
  func.func @transform_0(%arg0: i32) -> (i32, i32) {
    %c0_i32 = arith.constant 0 : i32
    %c0_i32_0 = arith.constant 0 : i32
    return %arg0, %c0_i32 : i32, i32
  }
  func.func @transform_1(%arg0: i32) -> (i32, i32) {
    %c0_i32 = arith.constant 0 : i32
    %c0_i32_0 = arith.constant 0 : i32
    %c0_i32_1 = arith.constant 0 : i32
    return %c0_i32, %c0_i32_0 : i32, i32
  }
  func.func @transform_2(%arg0: i32) -> (i32, i32) {
    %c0_i32 = arith.constant 0 : i32
    %c0_i32_0 = arith.constant 0 : i32
    %c0_i32_1 = arith.constant 0 : i32
    return %c0_i32, %c0_i32_0 : i32, i32
  }
  func.func @transform_3(%arg0: i32) -> (i32, i32) {
    %c0_i32 = arith.constant 0 : i32
    %c0_i32_0 = arith.constant 0 : i32
    %c0_i32_1 = arith.constant 0 : i32
    return %c0_i32, %c0_i32_0 : i32, i32
  }
  func.func @transform_4(%arg0: i32) -> (i32, i32) {
    %c0_i32 = arith.constant 0 : i32
    %c0_i32_0 = arith.constant 0 : i32
    %c0_i32_1 = arith.constant 0 : i32
    return %c0_i32, %c0_i32_0 : i32, i32
  }
  func.func @transform_5(%arg0: i32) -> (i32, i32) {
    %c0_i32 = arith.constant 0 : i32
    %c0_i32_0 = arith.constant 0 : i32
    %c0_i32_1 = arith.constant 0 : i32
    return %c0_i32, %c0_i32_0 : i32, i32
  }
  func.func @transform_6(%arg0: i32) -> (i32, i32) {
    %c0_i32 = arith.constant 0 : i32
    %c0_i32_0 = arith.constant 0 : i32
    %c0_i32_1 = arith.constant 0 : i32
    return %c0_i32, %c0_i32_0 : i32, i32
  }
  func.func @transform_7(%arg0: i32) -> (i32, i32) {
    %c0_i32 = arith.constant 0 : i32
    %c0_i32_0 = arith.constant 0 : i32
    %c0_i32_1 = arith.constant 0 : i32
    return %c0_i32, %c0_i32_0 : i32, i32
  }
  func.func @transform_8(%arg0: i32) -> (i32, i32) {
    %c0_i32 = arith.constant 0 : i32
    %c0_i32_0 = arith.constant 0 : i32
    %c0_i32_1 = arith.constant 0 : i32
    return %c0_i32, %c0_i32_0 : i32, i32
  }
  func.func @transform_9(%arg0: i32) -> (i32, i32) {
    %c0_i32 = arith.constant 0 : i32
    %c0_i32_0 = arith.constant 0 : i32
    return %arg0, %c0_i32 : i32, i32
  }
}

</mosaic_0001>

<bundles_post_ra>
// kernel: tpu_custom_call.1
= control target key start
LH: loop header
LB: loop body
LE: loop exit
PB: predicated region body
PF: predicated region fallthrough
CT: control target
= control target key end

     0   :  { %s1960_s0 = inlined_call_operand.hbm [shape: f32[16,128], index: 0, kind: input, shape index: {}]   ;;  %s1961_s1 = inlined_call_operand.hbm [shape: bf16[128,256], index: 1, kind: input, shape index: {}]   ;;  %s1962_s2 = inlined_call_operand.vmem [shape: f32[1,256], index: 2, kind: input, shape index: {}]   ;;  %s1963_s3 = inlined_call_operand.hbm [shape: bf16[256,128], index: 3, kind: input, shape index: {}]   ;;  %s1964_s4 = inlined_call_operand.vmem [shape: f32[1,128], index: 4, kind: input, shape index: {}]   ;;  %s1965_s5 = inlined_call_operand.hbm [shape: bf16[128,128], index: 5, kind: input, shape index: {}]   ;;  %s1966_s6 = inlined_call_operand.vmem [shape: f32[1,128], index: 6, kind: input, shape index: {}]   ;;  %s1967_s7 = inlined_call_operand.hbm [shape: bf16[128,128], index: 7, kind: input, shape index: {}]   ;;  %s1968_s8 = inlined_call_operand.vmem [shape: f32[1,128], index: 8, kind: input, shape index: {}]   ;;  %s1969_s9 = inlined_call_operand.hbm [shape: f32[16,128], index: 9, kind: output, shape index: {}]  }
   0x1   :  { %1974 = sst [smem:[#allocation16_spill]] %s1961_s1 }
   0x2   :  { %1975 = sst [smem:[#allocation17_spill]] %s1963_s3 }
   0x3   :  { %1976 = sst [smem:[#allocation18_spill]] %s1965_s5 }
   0x4   :  { %1977 = sst [smem:[#allocation19_spill]] %s1967_s7 }
   0x5   :  { %14 = vsyncpa [#allocation3], 0 }
   0x6   :  { %16 = vsyncpa [#allocation3 + $0x1], 0 }
   0x7   :  { %17 = vsyncpa [#allocation6], 0 }
   0x8   :  { %18 = vsyncpa [#allocation9], 0 }
   0x9   :  { %19 = vsyncpa [#allocation4], 0 }
   0xa   :  { %21 = vsyncpa [#allocation4 + $0x1], 0  ;;  %s1701_s30 = smov 0   ;;  %s1703_s10 = smov 0  }
   0xb   :  { %s1705_s11 = smov 0   ;;  %s1707_s12 = smov 0  }
   0xc LB: > { %s1637_s13 = smov [#allocation5]   ;;  %s1722_s15 = sadd.s32 4294967295, %s1635_s12   ;;  %s1635_s12 = sphi %s1707_s12, %s2001_s12   ;;  %s1631_s11 = sphi %s1705_s11, %s2000_s11   ;;  %s1627_s10 = sphi %s1703_s10, %s1999_s10   ;;  %s1623_s30 = sphi %s1701_s30, %s1998_s30  }
   0xd   : > { %s264_s14 = sshll.u32 %s1637_s13, 4  ;;  %p1118_p0 = scmp.ge.s32.totalorder %s1635_s12, 1  ;;  %s265_s14 = int_to_ptr.vmem [resolvable:$true] %s264_s14 }
   0xe   : > { %p1970_p1 = scmp.eq.s32.totalorder %s1722_s15, 0  ;;  %p252_p2 = scmp.lt.s32.totalorder %s1635_s12, 3 }
   0xf   : > { %s1638_s18 = smov [#allocation8]   ;;  %s1639_s20 = smov [#allocation7]  }
  0x10   : > { %p1727_p3 = pnand %p1118_p0, %p252_p2  ;;  %s296_s19 = sshll.u32 %s1638_s18, 4  ;;  %s1740_s19 = int_to_ptr.vmem [resolvable:$true] %s296_s19 }
  0x11   : > { %s1742_s21 = sshll.u32 %s1639_s20, 4  ;;  %s1442_s22 = scalar_lea.vmem %s265_s14, 2048  ;;  %s281_s21 = int_to_ptr.vmem [resolvable:$true] %s1742_s21 }
  0x12   : > { %s1978_s16 = scalar_select %p1727_p3, 1, 0 }
  0x13   : > { %p1290_p5 = pneg %p1727_p3  ;;  %p1443_p8 = scmp.ne.s32.totalorder %s265_s14, %s1442_s22 }
  0x14   : > { %p1450_p11 = scmp.lt.s32.totalorder %s265_s14, %s265_s14  ;;  %p1451_p12 = scmp.lt.s32.totalorder %s1442_s22, %s1442_s22 }
  0x15   : > { %p1736_p6 = pnand %p1290_p5, %p1970_p1 }
  0x16   : > { %p1452_p13 = por %p1451_p12, %p1450_p11 }
  0x17   : > { %p1433_p7 = pneg %p1736_p6 }
  0x19   : > { %p1445_p9 = pnand %p1443_p8, %p1433_p7 }
  0x1b   : > { %p1446_p10 = pneg %p1445_p9 }
  0x1d   : > { %p1453_p0 = pnand %p1452_p13, %p1446_p10 }
  0x1f   : > { %1456 = shalt.err (!%p1453_p0)
}
  0x20   : > { %s1640_s23 = smov 128   ;;  %s1641_s24 = smov 8  }
  0x21   : > { %s1980_s1 = sld [smem:[#allocation16_spill]]  ;;  %s1468_s27 = scalar_lea.vmem %s1740_s19, 1024 }
  0x22   : > { %p1469_p2 = scmp.ne.s32.totalorder %s1740_s19, %s1468_s27  ;;  %p1476_p9 = scmp.lt.s32.totalorder %s1740_s19, %s1740_s19 }
  0x23   : > { %p1477_p10 = scmp.lt.s32.totalorder %s1468_s27, %s1468_s27 }
  0x24   : > { %p1471_p5 = pnand %p1469_p2, %p1433_p7 }
  0x25   : > { %p1478_p11 = por %p1477_p10, %p1476_p9 }
  0x26   : > { %p1472_p8 = pneg %p1471_p5 }
  0x27   : > { %1293 = dma.hbm_to_vmem [thread:$0]  (!%p1736_p6), %s1980_s1, 2048, %s265_s14, [#allocation6], %s1640_s23, %s1640_s23, %s1641_s24  }
  0x28   : > { %p1479_p12 = pnand %p1478_p11, %p1472_p8 }
  0x2a   : > { %1482 = shalt.err (!%p1479_p12)
}
  0x2b   : > { %s1642_s28 = smov 64   ;;  %s1643_s29 = smov 4  }
  0x2c   : > { %s1981_s5 = sld [smem:[#allocation18_spill]]  ;;  %s1494_s18 = scalar_lea.vmem %s281_s21, 2048 }
  0x2d   : > { %p1495_p13 = scmp.ne.s32.totalorder %s281_s21, %s1494_s18  ;;  %p1502_p5 = scmp.lt.s32.totalorder %s281_s21, %s281_s21 }
  0x2e   : > { %p1503_p8 = scmp.lt.s32.totalorder %s1494_s18, %s1494_s18 }
  0x2f   : > { %p1497_p0 = pnand %p1495_p13, %p1433_p7 }
  0x30   : > { %p1504_p9 = por %p1503_p8, %p1502_p5 }
  0x31   : > { %p1498_p2 = pneg %p1497_p0 }
  0x32   : > { %1299 = dma.hbm_to_vmem [thread:$0]  (!%p1736_p6), %s1981_s5, 1024, %s1740_s19, [#allocation9], %s1642_s28, %s1642_s28, %s1643_s29  }
  0x33   : > { %p1505_p10 = pnand %p1504_p9, %p1498_p2 }
  0x35   : > { %1508 = shalt.err (!%p1505_p10)
}
  0x36   : > { %s1982_s3 = sld [smem:[#allocation17_spill]]  ;;  %s1644_s19 = smov [#allocation10]  }
  0x37   : > { %s312_s23 = sshll.u32 %s1644_s19, 4  ;;  %s313_s23 = int_to_ptr.vmem [resolvable:$true] %s312_s23 }
  0x38   : > { %s1520_s24 = scalar_lea.vmem %s313_s23, 1024  ;;  %p1528_p0 = scmp.lt.s32.totalorder %s313_s23, %s313_s23 }
  0x39   : > { %p1521_p11 = scmp.ne.s32.totalorder %s313_s23, %s1520_s24  ;;  %p1529_p5 = scmp.lt.s32.totalorder %s1520_s24, %s1520_s24 }
  0x3b   : > { %p1523_p12 = pnand %p1521_p11, %p1433_p7  ;;  %p1530_p2 = por %p1529_p5, %p1528_p0 }
  0x3c   : > { %1296 = dma.hbm_to_vmem [thread:$0]  (!%p1736_p6), %s1982_s3, 2048, %s281_s21, [#allocation6], %s1642_s28, %s1642_s28, %s1643_s29  }
  0x3d   : > { %p1524_p13 = pneg %p1523_p12 }
  0x3f   : > { %p1531_p8 = pnand %p1530_p2, %p1524_p13 }
  0x41   : > { %1534 = shalt.err (!%p1531_p8)
}
  0x42   : > { %s1983_s7 = sld [smem:[#allocation19_spill]]  ;;  %s1117_s21 = sadd.s32 4294967294, %s1635_s12  }
  0x43   : > { %s1786_s17 = sadd.s32 1, %s1635_s12   ;;  %s34_s13 = sadd.s32 1, %s1631_s11 }
  0x44   : > { %s31_s27 = ssub.s32 %s1635_s12, %s1786_s17  ;;  %p41_p9 = scmp.ne.s32.totalorder %s1631_s11, %s1627_s10 }
  0x45   : > { %p32_p7 = scmp.eq.s32.totalorder %s31_s27, 0  ;;  %p42_p10 = scmp.eq.s32.totalorder %s1635_s12, 0 }
  0x46   : > { %p47_p11 = scmp.ne.s32.totalorder %s1627_s10, %s1623_s30  ;;  %p239_p13 = scmp.eq.s32.totalorder %s1722_s15, 1 }
  0x47   : > { %s1797_s14 = scalar_select %p32_p7, %s1631_s11, %s34_s13  }
  0x48   : > { %1302 = dma.hbm_to_vmem [thread:$0]  (!%p1736_p6), %s1983_s7, 1024, %s313_s23, [#allocation9], %s1642_s28, %s1642_s28, %s1643_s29  }
  0x49   : > { %p1799_p12 = por %p42_p10, %p41_p9  ;;  %p1805_p6 = por %p1970_p1, %p47_p11 }
  0x4a   : > { %p245_p0 = scmp.eq.s32.totalorder %s1117_s21, 1  ;;  %p1315_p5 = scmp.lt.s32.totalorder %s1635_s12, 2 }
  0x4b   : > { %s1985_s28 = scalar_select %p1805_p6, 1, 0 }
  0x4c   : > { %s329_s29 = sand.u32 1, %s1631_s11   ;;  %p1812_p2 = por %p239_p13, %p41_p9 }
  0x4d   : > { %p1816_p8 = por %p245_p0, %p47_p11  ;;  %s1124_s19 = sshll.u32 %s329_s29, 3 }
  0x4e   : > { %s1986_s20 = scalar_select %p1812_p2, 1, 0 }
  0x4f   : > { %s1987_s22 = scalar_select %p1816_p8, 1, 0 }
  0x50   : > { %s1125_s23 = sshll.u32 %s1635_s12, 7  ;;  %s333_s21 = scalar_lea.vmem [#allocation2], %s1124_s19 }
  0x51   : > { %s1824_s26 = scalar_lea.hbm %s1960_s0, %s1125_s23  ;;  %s340_s27 = sshll.u32 %s333_s21, 4  ;;  %s341_s27 = int_to_ptr.vmem [resolvable:$true] %s340_s27 }
  0x52   : > { %p1828_p7 = pnand %p1315_p5, %p1799_p12  ;;  %s330_s1 = scalar_lea.sflag [#allocation3], %s329_s29 }
  0x53   : > { %s1535_s3 = scalar_lea.hbm %s1824_s26, 128  ;;  %s1540_s25 = scalar_lea.hbm %s1960_s0, 256 }
  0x54   : > { %p1536_p9 = scmp.ne.s32.totalorder %s1824_s26, %s1535_s3  ;;  %p1537_p10 = pneg %p1828_p7 }
  0x55   : > { %p1541_p0 = scmp.lt.s32.totalorder %s1824_s26, %s1960_s0  ;;  %p1542_p12 = scmp.lt.s32.totalorder %s1540_s25, %s1535_s3 }
  0x56   : > { %p1538_p11 = pnand %p1537_p10, %p1536_p9 }
  0x57   : > { %p1543_p5 = por %p1542_p12, %p1541_p0 }
  0x58   : > { %p1539_p13 = pneg %p1538_p11 }
  0x5a   : > { %p1544_p4 = pnand %p1543_p5, %p1539_p13 }
  0x5c   : > { %1547 = shalt.err (!%p1544_p4)
}
  0x5d   : > { %s1548_s18 = scalar_lea.vmem %s341_s27, 128  ;;  %s1645_s29 = smov [#allocation2]  }
  0x5e   : > { %p1549_p1 = scmp.ne.s32.totalorder %s341_s27, %s1548_s18  ;;  %s1553_s5 = sshll.u32 %s1645_s29, 4  ;;  %s1554_s5 = int_to_ptr.vmem [resolvable:$false] %s1553_s5 }
  0x5f   : > { %s1555_s7 = scalar_lea.vmem %s1554_s5, 256  ;;  %p1556_p9 = scmp.lt.s32.totalorder %s341_s27, %s1554_s5 }
  0x60   : > { %p1551_p8 = pnand %p1549_p1, %p1537_p10  ;;  %p1557_p11 = scmp.lt.s32.totalorder %s1555_s7, %s1548_s18 }
  0x62   : > { %p1552_p2 = pneg %p1551_p8  ;;  %p1558_p6 = por %p1557_p11, %p1556_p9 }
  0x64   : > { %p1559_p3 = pnand %p1558_p6, %p1552_p2 }
  0x66   : > { %1562 = shalt.err (!%p1559_p3)
}
  0x67   : > { %1306 = dma.hbm_to_vmem [thread:$0]  (!%p1828_p7), %s1824_s26, 128, %s341_s27, %s330_s1  }
  0x68   : > { %p1989_p13 = scmp.ne.s32.totalorder %s1978_s16, 0 }
  0x69   : > { %s1849_s3 = sand.u32 (!%p1989_p13), 1, %s1627_s10   ;;  %p1990_p1 = scmp.ne.s32.totalorder (!%p1989_p13), %s1985_s28, 0 }
  0x6a   : > { %349 = sbr.rel (%p1989_p13) target bundleno = 1030 (0x406), region = 56  ;;  %s1127_s23 = sshll.u32 (!%p1989_p13), %s1849_s3, 3 }
  0x6b   : > { %s352_s5 = scalar_lea.sflag (!%p1989_p13), [#allocation3], %s1849_s3  ;;  %s1855_s7 = scalar_lea.vmem (!%p1989_p13), [#allocation2], %s1127_s23 }
  0x6f   : > { %1606 = dma.done.wait (%p1990_p1), %s352_s5, 128  }
  0x70   : > { %1608 = vsyncadd (%p1990_p1), %s352_s5, 4294967168  ;;  %p1991_p3 = scmp.eq.s32.totalorder %s1722_s15, 0 }
  0x72   : > { %1610 = dma.done.wait (%p1991_p3), [#allocation6], 4096   ;;  %p1992_p4 = pmov %p1991_p3 }
  0x73   : > { %p1993_p6 = pmov %p1991_p3 }
  0x74   : > { %1612 = vsyncadd (%p1992_p4), [#allocation6], 4294963200 }
  0x75   : > { %1614 = dma.done.wait (%p1993_p6), [#allocation9], 2048   ;;  %p1994_p2 = pmov %p1991_p3 }
  0x76   : > { %v1646_v0 = vmov 0   ;;  %v1365_v1 = vld [vmem:[#allocation5 + $0x74] ss:$8 sps:$4 sm:$0xff]   ;;  %v1367_v2 = vld [vmem:[#allocation5 + $0x70] ss:$8 sps:$4 sm:$0xff]   ;;  %v1393_v15 = vld [vmem:[#allocation7 + $0x68] sm:$0xff]   ;;  %v427_v35 = vlaneseq }
  0x77   : > { %1616 = vsyncadd (%p1994_p2), [#allocation9], 4294965248  ;;  %549 = vmatprep.mubr.bf16.mxu0 %v1646_v0  ;;  %517 = vmatprep.subr.bf16.mxu0 %v1365_v1  ;;  %v1368_v3 = vld [vmem:[#allocation5 + $0x64] ss:$8 sps:$4 sm:$0xff]   ;;  %v1370_v4 = vld [vmem:[#allocation5 + $0x60] ss:$8 sps:$4 sm:$0xff]  }
  0x78   : > { %518 = vmatpush1.bf16.msra.mxu0 %v1367_v2  ;;  %v1371_v5 = vld [vmem:[#allocation5 + $0x54] ss:$8 sps:$4 sm:$0xff]   ;;  %v1373_v6 = vld [vmem:[#allocation5 + $0x50] ss:$8 sps:$4 sm:$0xff]   ;;  %v1374_v7 = vld [vmem:[#allocation5 + $0x44] ss:$8 sps:$4 sm:$0xff]  }
  0x79   : > { %519 = vmatprep.subr.bf16.mxu0 %v1368_v3  ;;  %v1376_v8 = vld [vmem:[#allocation5 + $0x40] ss:$8 sps:$4 sm:$0xff]   ;;  %v1377_v9 = vld [vmem:[#allocation5 + $0x34] ss:$8 sps:$4 sm:$0xff]   ;;  %v1379_v12 = vld [vmem:[#allocation5 + $0x30] ss:$8 sps:$4 sm:$0xff]  }
  0x7a   : > { %v1389_v10 = vld [vmem:[#allocation7 + $0x78] sm:$0xff]   ;;  %v1391_v13 = vld [vmem:[#allocation7 + $0x70] sm:$0xff]   ;;  %v1380_v16 = vld [vmem:[#allocation5 + $0x24] ss:$8 sps:$4 sm:$0xff]   ;;  %v428_v36 = vshrl.u32 %v427_v35, 7  ;;  %v1877_v52 = vand.u32 127, %v427_v35 }
  0x7b   : > { %v1390_v11 = vld [vmem:[#allocation7 + $0x38] sm:$0xff]   ;;  %1190 = vmatprep.subr.bf16.mxu1 %v1389_v10  ;;  %v1392_v14 = vld [vmem:[#allocation7 + $0x30] sm:$0xff]   ;;  %v1382_v17 = vld [vmem:[#allocation5 + $0x20] ss:$8 sps:$4 sm:$0xff]   ;;  %v1647_v55 = vmov 0.0   ;;  %vm1648_vm1 = vmmov 0  }
  0x7c   : > { %520 = vmatpush1.bf16.msra.mxu0 %v1370_v4  ;;  %1191 = vmatpush3.bf16.msra.mxu1 %v1390_v11  ;;  %v1394_v18 = vld [vmem:[#allocation7 + $0x28] sm:$0xff]   ;;  %v1383_v19 = vld [vmem:[#allocation5 + $0x14] ss:$8 sps:$4 sm:$0xff]   ;;  %v1385_v20 = vld [vmem:[#allocation5 + $0x10] ss:$8 sps:$4 sm:$0xff]   ;;  %v429_v37 = vsub.s32 0, %v428_v36 }
  0x7d   : > { %521 = vmatprep.subr.bf16.mxu0 %v1371_v5  ;;  %1192 = vmatprep.subr.bf16.mxu1 %v1391_v13  ;;  %v1386_v21 = vld [vmem:[#allocation5 + $0x4] ss:$8 sps:$4 sm:$0xff]   ;;  %v1388_v22 = vld [vmem:[#allocation5] ss:$8 sps:$4 sm:$0xff]   ;;  %v1870_v23 = vld [vmem:[%s1855_s7] sm:$0xff]  ;;  %v433_v39 = vsub.s32 1, %v428_v36 }
  0x7e   : > { %v408_v24 = vpack.c.bf16 %v1870_v23, %v1870_v23  ;;  %v1395_v25 = vld [vmem:[#allocation7 + $0x60] sm:$0xff]   ;;  %v1397_v27 = vld [vmem:[#allocation7 + $0x58] sm:$0xff]   ;;  %v1399_v29 = vld [vmem:[#allocation7 + $0x50] sm:$0xff]   ;;  %vm979_vm0 = vcmp.ge.s32.totalorder %v1877_v52, 72  ;;  %vm745_vm2 = vcmp.lt.s32.totalorder %v1877_v52, 64  ;;  %s1649_s27 = smov 64  }
  0x7f   : > { %v1396_v26 = vld [vmem:[#allocation7 + $0x20] sm:$0xff]   ;;  %v1398_v28 = vld [vmem:[#allocation7 + $0x18] sm:$0xff]   ;;  %v1400_v30 = vld [vmem:[#allocation7 + $0x10] sm:$0xff]   ;;  %v980_v53 = vsel %vm979_vm0, %v1870_v23, 0.0  ;;  %vm973_vm4 = vcmp.ge.s32.totalorder %v1877_v52, 32  ;;  %s1187_s21 = sshll.u32 %s1722_s15, 7 }
  0x80   : > { %522 = vmatpush1.bf16.msra.mxu0 %v1373_v6  ;;  %1193 = vmatpush3.bf16.msra.mxu1 %v1392_v14  ;;  %v1401_v31 = vld [vmem:[#allocation7 + $0x48] sm:$0xff]   ;;  %v1403_v33 = vld [vmem:[#allocation7 + $0x40] sm:$0xff]   ;;  %v425_v38 = vld [vmem:[%s1962_s2] sm:$0x3]  ;;  %s405_s18 = scalar_lea.vmem [#allocation11], %s1127_s23  ;;  %s1923_s1 = scalar_lea.hbm %s1969_s9, %s1187_s21 }
  0x81   : > { %523 = vmatprep.subr.bf16.mxu0 %v1374_v7  ;;  %1194 = vmatprep.subr.bf16.mxu1 %v1393_v15  ;;  %v1402_v32 = vld [vmem:[#allocation7 + $0x8] sm:$0xff]   ;;  %v1404_v34 = vld [vmem:[#allocation7] sm:$0xff]   ;;  %v430_v40 = vrot.slane %v425_v38, %v429_v37  ;;  %v434_v41 = vrot.slane %v425_v38, %v433_v39  ;;  %v1405_v54 = vld [vmem:[#allocation8 + $0x38] sm:$0xff]   ;;  %s1009_s29 = sshll.u32 %s405_s18, 4  ;;  %s996_s16 = scalar_lea.sflag [#allocation4], %s1849_s3  ;;  %s1010_s29 = int_to_ptr.vmem [resolvable:$true] %s1009_s29 }
  0x82   : > { %981 = vadd.xlane.f32.xlu0 %v980_v53  ;;  %v1406_v56 = vld [vmem:[#allocation8 + $0x30] sm:$0xff]   ;;  %v1407_v57 = vld [vmem:[#allocation8 + $0x28] sm:$0xff]   ;;  %v1408_v58 = vld [vmem:[#allocation8 + $0x20] sm:$0xff]   ;;  %s1563_s28 = scalar_lea.vmem %s1010_s29, 128  ;;  %p1995_p7 = scmp.ne.s32.totalorder %s1986_s20, 0 }
  0x83   : > { %v1409_v59 = vld [vmem:[#allocation8 + $0x18] sm:$0xff]   ;;  %v1410_v60 = vld [vmem:[#allocation8 + $0x10] sm:$0xff]   ;;  %v1411_v61 = vld [vmem:[#allocation8 + $0x8] sm:$0xff]   ;;  %p1564_p8 = scmp.ne.s32.totalorder %s1010_s29, %s1563_s28  ;;  %s1650_s26 = smov [#allocation11]  }
  0x84   : > { %524 = vmatpush1.bf16.msra.mxu0 %v1376_v8  ;;  %1195 = vmatpush3.bf16.msra.mxu1 %v1394_v18  ;;  %v1412_v62 = vld [vmem:[#allocation8] sm:$0xff]   ;;  %v1149_v0 = vld [vmem:[%s1964_s4] ss:$0 sm:$0xff]  ;;  %vm974_vm5 = vmand %vm973_vm4, %vm745_vm2  ;;  %s1567_s15 = sshll.u32 %s1650_s26, 4  ;;  %s1568_s15 = int_to_ptr.vmem [resolvable:$false] %s1567_s15 }
  0x85   : > { %525 = vmatprep.subr.bf16.mxu0 %v1377_v9  ;;  %1196 = vmatprep.subr.bf16.mxu1 %v1395_v25  ;;  %v1413_v9 = vld [vmem:[#allocation10 + $0x38] sm:$0xff]   ;;  %v1414_v10 = vld [vmem:[#allocation10 + $0x30] sm:$0xff]   ;;  %p1565_p10 = pnand %p1564_p8, %p1995_p7  ;;  %s1569_s23 = scalar_lea.vmem %s1568_s15, 256 }
  0x86   : > { %v1418_v18 = vld [vmem:[#allocation10 + $0x10] sm:$0xff]   ;;  %p1570_p12 = scmp.lt.s32.totalorder %s1010_s29, %s1568_s15  ;;  %p1571_p5 = scmp.lt.s32.totalorder %s1569_s23, %s1563_s28 }
  0x87   : > { %v1176_v35 = vld [vmem:[%s1968_s8] ss:$0 sm:$0xff]  ;;  %p1566_p0 = pneg %p1565_p10 }
  0x88   : > { %526 = vmatpush1.bf16.msra.mxu0 %v1379_v12  ;;  %1197 = vmatpush3.bf16.msra.mxu1 %v1396_v26  ;;  %v1415_v12 = vld [vmem:[#allocation10 + $0x28] sm:$0xff]   ;;  %p1572_p9 = por %p1571_p5, %p1570_p12 }
  0x89   : > { %527 = vmatprep.subr.bf16.mxu0 %v1380_v16  ;;  %1198 = vmatprep.subr.bf16.mxu1 %v1397_v27  ;;  %v1416_v16 = vld [vmem:[#allocation10 + $0x20] sm:$0xff]  }
  0x8a   : > { %p1573_p11 = pnand %p1572_p9, %p1566_p0 }
  0x8c   : > { %528 = vmatpush1.bf16.msra.mxu0 %v1382_v17  ;;  %1199 = vmatpush3.bf16.msra.mxu1 %v1398_v28  ;;  %v1417_v17 = vld [vmem:[#allocation10 + $0x18] sm:$0xff]  }
  0x8d   : > { %529 = vmatprep.subr.bf16.mxu0 %v1383_v19  ;;  %1200 = vmatprep.subr.bf16.mxu1 %v1399_v29  ;;  %v1419_v19 = vld [vmem:[#allocation10 + $0x8] sm:$0xff]  }
  0x90   : > { %530 = vmatpush1.bf16.msra.mxu0 %v1385_v20  ;;  %1201 = vmatpush3.bf16.msra.mxu1 %v1400_v30  ;;  %v1420_v20 = vld [vmem:[#allocation10] sm:$0xff]  }
  0x91   : > { %531 = vmatprep.subr.bf16.mxu0 %v1386_v21  ;;  %1202 = vmatprep.subr.bf16.mxu1 %v1401_v31  ;;  %v1167_v21 = vld [vmem:[%s1966_s6] ss:$0 sm:$0xff] }
  0x94   : > { %532 = vmatpush1.bf16.msra.mxu0 %v1388_v22  ;;  %1203 = vmatpush3.bf16.msra.mxu1 %v1402_v32 }
  0x95   : > { %1204 = vmatprep.subr.bf16.mxu1 %v1403_v33  ;;  %1230 = vmatprep.subr.bf16.mxu0 %v1647_v55 }
  0x97   : > { %550 = vmatmul.mubr.bf16.vlgmr.msra.gmra.mxu0 %v408_v24 }
  0x98   : > { %1205 = vmatpush3.bf16.msra.mxu1 %v1404_v34  ;;  %1231 = vmatpush3.bf16.msra.mxu0 %v1405_v54 }
  0x99   : > { %1250 = vmatprep.subr.bf16.mxu1 %v1647_v55  ;;  %1232 = vmatprep.subr.bf16.mxu0 %v1647_v55 }
  0x9a   : > { %1246 = vmatprep.mubr.msk.bf16.mxu0 %vm1648_vm1, %v1647_v55 }
  0x9c   : > { %1233 = vmatpush3.bf16.msra.mxu0 %v1406_v56 }
  0x9d   : > { %1234 = vmatprep.subr.bf16.mxu0 %v1647_v55 }
  0xa0   : > { %1235 = vmatpush3.bf16.msra.mxu0 %v1407_v57 }
  0xa1   : > { %1236 = vmatprep.subr.bf16.mxu0 %v1647_v55 }
  0xa4   : > { %1237 = vmatpush3.bf16.msra.mxu0 %v1408_v58 }
  0xa5   : > { %1238 = vmatprep.subr.bf16.mxu0 %v1647_v55 }
  0xa8   : > { %1239 = vmatpush3.bf16.msra.mxu0 %v1409_v59 }
  0xa9   : > { %1240 = vmatprep.subr.bf16.mxu0 %v1647_v55 }
  0xac   : > { %1241 = vmatpush3.bf16.msra.mxu0 %v1410_v60 }
  0xad   : > { %1242 = vmatprep.subr.bf16.mxu0 %v1647_v55 }
  0xb0   : > { %1243 = vmatpush3.bf16.msra.mxu0 %v1411_v61 }
  0xb1   : > { %1244 = vmatprep.subr.bf16.mxu0 %v1647_v55 }
  0xb4   : > { %1245 = vmatpush3.bf16.msra.mxu0 %v1412_v62 }
 0x10b   : > { %v982_v30 = vpop.xlane.xlu0 %981 }
 0x10c   : > { %vm983_vm3 = vcmp.gt.f32.partialorder %v982_v30, 0.0 }
 0x10d   : > { %v1185_v33 = vsel %vm983_vm3, 1.0, %v1647_v55 }
 0x157   : > { %v551_v42 = vpop.f32.mrf.mxu0 }
 0x158   : > { %v552_v43 = vadd.f32 %v551_v42, %v430_v40 }
 0x159   : > { %v553_v44 = vpop.f32.mrf.mxu0 }
 0x15a   : > { %v554_v45 = vadd.f32 %v553_v44, %v434_v41  ;;  %1421 = vtanh.f32 %v552_v43 }
 0x15b   : > { %v555_v46 = vpop.f32.mrf.mxu0 }
 0x15c   : > { %1423 = vtanh.f32 %v554_v45 }
 0x15d   : > { %v556_v47 = vpop.f32.mrf.mxu0 }
 0x167   : > { %v1422_v48 = vpop.eup %1421 }
 0x168   : > { %v560_v51 = vpack.c.bf16 %v1422_v48, %v1422_v48 }
 0x169   : > { %v1424_v49 = vpop.eup %1423 }
 0x16a   : > { %v561_v50 = vpack.c.bf16 %v1424_v49, %v1424_v49 }
 0x16c   : > { %729 = vmatprep.mubr.bf16.mxu1 %v561_v50 }
 0x16d   : > { %730 = vmatmul.mubr.bf16.vlgmr.msra.gmra.mxu1 %v560_v51 }
 0x16e   : > { %1266 = vmatprep.mubr.msk.bf16.mxu1 %vm1648_vm1, %v1647_v55  ;;  %1251 = vmatpush3.bf16.msra.mxu1 %v1413_v9 }
 0x16f   : > { %1252 = vmatprep.subr.bf16.mxu1 %v1647_v55 }
 0x172   : > { %1253 = vmatpush3.bf16.msra.mxu1 %v1414_v10 }
 0x173   : > { %1254 = vmatprep.subr.bf16.mxu1 %v1647_v55 }
 0x176   : > { %1255 = vmatpush3.bf16.msra.mxu1 %v1415_v12 }
 0x177   : > { %1256 = vmatprep.subr.bf16.mxu1 %v1647_v55 }
 0x17a   : > { %1257 = vmatpush3.bf16.msra.mxu1 %v1416_v16 }
 0x17b   : > { %1258 = vmatprep.subr.bf16.mxu1 %v1647_v55 }
 0x17e   : > { %1259 = vmatpush3.bf16.msra.mxu1 %v1417_v17 }
 0x17f   : > { %1260 = vmatprep.subr.bf16.mxu1 %v1647_v55 }
 0x182   : > { %1261 = vmatpush3.bf16.msra.mxu1 %v1418_v18 }
 0x183   : > { %1262 = vmatprep.subr.bf16.mxu1 %v1647_v55 }
 0x186   : > { %1263 = vmatpush3.bf16.msra.mxu1 %v1419_v19 }
 0x187   : > { %1264 = vmatprep.subr.bf16.mxu1 %v1647_v55 }
 0x18a   : > { %1265 = vmatpush3.bf16.msra.mxu1 %v1420_v20 }
 0x22d   : > { %v1206_v63 = vpop.f32.mrf.mxu1 }
 0x22f   : > { %v1207_v1 = vpop.f32.mrf.mxu1 }
 0x230   : > { %v1208_v2 = vadd.f32 %v1207_v1, %v1206_v63 }
 0x231   : > { %v1209_v3 = vpop.f32.mrf.mxu1 }
 0x232   : > { %v732_v4 = vadd.f32 %v1208_v2, %v1149_v0 }
 0x233   : > { %v1210_v5 = vpop.f32.mrf.mxu1 }
 0x234   : > { %v1166_v6 = vmul.f32 -1.442695, %v732_v4 }
 0x236   : > { %1425 = vpow2.f32 %v1166_v6 }
 0x243   : > { %v1426_v7 = vpop.eup %1425 }
 0x244   : > { %v740_v8 = vadd.f32 1.0, %v1426_v7 }
 0x246   : > { %1427 = vrcp.f32 %v740_v8 }
 0x253   : > { %v1428_v11 = vpop.eup %1427 }
 0x254   : > { %977 = vrot.lane.b32.xlu0 %v1428_v11, %s1649_s27  ;;  %v746_v13 = vsel %vm745_vm2, %v1428_v11, 1.0 }
 0x255   : > { %v747_v14 = vmul.f32 %v746_v13, %v1870_v23 }
 0x257   : > { %v748_v15 = vpack.c.bf16 %v747_v14, %v747_v14 }
 0x259   : > { %1247 = vmatmul.mubr.bf16.vlgmr.msra.gmra.mxu0 %v748_v15 }
 0x2c6   : > { %v978_v31 = vpop.permute.xlu0 %977 }
 0x2c7   : > { %v986_v32 = vsub.f32 1.0, %v978_v31 }
 0x2c9   : > { %v987_v34 = vmul.f32 %v1185_v33, %v986_v32 }
 0x2cb   : > { %v989_v38 = vsub.f32 1.0, %v987_v34 }
 0x2cd   : > { %v990_v43 = vmul.f32 %v989_v38, %v1870_v23 }
 0x319   : > { %v854_v22 = vpop.f32.mrf.mxu0 }
 0x31a   : > { %v855_v24 = vadd.f32 %v1167_v21, %v854_v22 }
 0x31b   : > { %v1248_v25 = vpop.f32.mrf.mxu0 }
 0x31c   : > { %1429 = vtanh.f32 %v855_v24 }
 0x31d   : > { %v857_v26 = vpop.f32.mrf.mxu0 }
 0x31f   : > { %v1249_v27 = vpop.f32.mrf.mxu0 }
 0x329   : > { %v1430_v28 = vpop.eup %1429 }
 0x32a   : > { %v861_v29 = vpack.c.bf16 %v1430_v28, %v1430_v28 }
 0x32c   : > { %1267 = vmatmul.mubr.bf16.vlgmr.msra.gmra.mxu1 %v861_v29 }
 0x3ec   : > { %v967_v36 = vpop.f32.mrf.mxu1 }
 0x3ed   : > { %v968_v37 = vadd.f32 %v1176_v35, %v967_v36 }
 0x3ee   : > { %v1268_v39 = vpop.f32.mrf.mxu1 }
 0x3ef   : > { %v975_v40 = vand.u32 2147483647, %v968_v37 }
 0x3f0   : > { %v970_v41 = vpop.f32.mrf.mxu1 }
 0x3f1   : > { %v976_v42 = vsel %vm974_vm5, %v975_v40, %v968_v37 }
 0x3f2   : > { %v988_v44 = vmul.f32 %v987_v34, %v976_v42  ;;  %v1269_v45 = vpop.f32.mrf.mxu1 }
 0x3f4   : > { %v991_v46 = vadd.f32 %v990_v43, %v988_v44 }
 0x3f6   : > { %v992_v47 = vand.u32 2147483647, %v991_v46 }
 0x3f8   : > { %v993_v48 = vsel %vm974_vm5, %v992_v47, %v991_v46 }
 0x3f9   : > { %994 = vst [vmem:[%s405_s18] sm:$0xff] %v993_v48 }
 0x3fa   : > { %1576 = shalt.err (!%p1573_p11)
}
 0x3fb   : > { %s1577_s27 = scalar_lea.hbm %s1923_s1, 128  ;;  %s1581_s24 = scalar_lea.hbm %s1969_s9, 256 }
 0x3fc   : > { %p1578_p13 = scmp.ne.s32.totalorder %s1923_s1, %s1577_s27  ;;  %p1582_p4 = scmp.lt.s32.totalorder %s1923_s1, %s1969_s9 }
 0x3fd   : > { %p1583_p6 = scmp.lt.s32.totalorder %s1581_s24, %s1577_s27 }
 0x3fe   : > { %p1579_p1 = pnand %p1578_p13, %p1995_p7 }
 0x3ff   : > { %p1584_p2 = por %p1583_p6, %p1582_p4 }
 0x400   : > { %p1580_p3 = pneg %p1579_p1 }
 0x402   : > { %p1585_p8 = pnand %p1584_p2, %p1580_p3 }
 0x404   : > { %1588 = shalt.err (!%p1585_p8)
}
 0x405   : > { %1288 = dma.vmem_to_hbm [thread:$0]  (%p1995_p7), %s1010_s29, 128, %s1923_s1, %s996_s16  }
 0x406 PF: > { %s1021_s21 = sand.u32 1, %s1623_s30   ;;  %p1996_p10 = scmp.ne.s32.totalorder %s1987_s22, 0 }
 0x407   : > { %p1997_p0 = scmp.ge.s32.totalorder %s1635_s12, 2  ;;  %s1022_s18 = scalar_lea.sflag [#allocation4], %s1021_s21 }
 0x409   : > { %p1308_p12 = pnand %p1997_p0, %p1996_p10 }
 0x40b   : > { %p1309_p5 = pneg %p1308_p12 }
 0x40d   : > { %1618 = dma.done.wait (%p1309_p5), %s1022_s18, 128  }
 0x40e   : > { %1620 = vsyncadd (%p1309_p5), %s1022_s18, 4294967168  ;;  %p24_p9 = scmp.ge.s32.totalorder %s1786_s17, 4   ;;  %s1998_s30 = smov %s1627_s10 }
 0x40f   : > { %s1999_s10 = smov %s1631_s11  ;;  %s2000_s11 = smov %s1797_s14 }
 0x410   : > { %s2001_s12 = smov %s1786_s17  ;;  %26 = sbr.rel (!%p24_p9) target bundleno = 12 (0xc), region = 117 }
 0x415   :  { %1027 = vsyncpa [#allocation3], 1 }
 0x416   :  { %1029 = vsyncpa [#allocation3 + $0x1], 1 }
 0x417   :  { %1030 = vsyncpa [#allocation6], 1 }
 0x418   :  { %1031 = vsyncpa [#allocation9], 1 }
 0x419   :  { %1032 = vsyncpa [#allocation4], 1 }
 0x41a   :  { %1034 = vsyncpa [#allocation4 + $0x1], 1 }

</bundles_post_ra>
